<compile_context>
chip_gen: v5e
topology: v5e:2x2
jax: 0.10.0
libtpu: 0.0.40
codegen_flags: <defaults>
</compile_context>

<pallas_src>
import functools

import jax
import jax.numpy as jnp
from jax.experimental import pallas as pl
from jax.experimental.pallas import tpu as pltpu


def _round_up(x: int, m: int) -> int:
    return (x + m - 1) // m * m


def _lora_kernel(x_ref, a_ref, b_ref, o_ref, *, scaling):
    # x_ref: (tm, in_features)   a_ref: (in_features, rank_p)
    # b_ref: (rank_p, out_p)     o_ref: (tm, out_p)
    # First matmul on the MXU with fp32 accumulation.
    xa = jnp.dot(x_ref[...], a_ref[...], preferred_element_type=jnp.float32)
    # Feed the second matmul in the input dtype (native-rate MXU for bf16
    # inputs; identity cast for f32). Accumulation stays fp32.
    xa = xa.astype(x_ref.dtype)
    y = jnp.dot(xa, b_ref[...], preferred_element_type=jnp.float32)
    # Fused scaling on the VPU; cast to the output dtype on the store.
    o_ref[...] = (y * scaling).astype(o_ref.dtype)


def _vmem_capacity_bytes() -> int:
    try:
        return int(pltpu.get_tpu_info().vmem_capacity_bytes)
    except Exception:
        return 64 * 1024 * 1024  # conservative default (v7x per-core VMEM)


def _choose_tm(requested_tm, M, in_f, out_p, rank_p, itemsize, budget_bytes):
    """Largest MXU-friendly row tile (multiple of 128) whose working set fits."""

    def step_bytes(t):
        return (
            2 * t * in_f * itemsize      # double-buffered x tiles
            + 2 * t * out_p * itemsize   # double-buffered output tiles
            + t * rank_p * 4             # fp32 xa intermediate
            + t * out_p * 4              # fp32 y before the final cast
        )

    cap = max(128, _round_up(requested_tm, 128))
    tm = 128
    for cand in (1024, 512, 384, 256, 128):
        if cand <= cap and step_bytes(cand) <= budget_bytes:
            tm = cand
            break
    # Don't tile past the (8-aligned) number of real rows.
    return max(8, min(tm, _round_up(M, 8)))


def _build_lora_call(*, M_pad, in_f, rank_p, out_p, tm, dtype, scaling,
                     vmem_limit_bytes, cost_estimate, single_buffer_weights):
    weight_kwargs = {}
    if single_buffer_weights:
        # Grid-invariant weights (constant index_map): nothing to prefetch,
        # keep a single VMEM copy instead of the default double buffer.
        weight_kwargs["pipeline_mode"] = pl.Buffered(1)
    return pl.pallas_call(
        functools.partial(_lora_kernel, scaling=scaling),
        out_shape=jax.ShapeDtypeStruct((M_pad, out_p), dtype),
        grid_spec=pltpu.PrefetchScalarGridSpec(
            num_scalar_prefetch=0,
            grid=(M_pad // tm,),
            in_specs=[
                pl.BlockSpec((tm, in_f), lambda i: (i, 0)),
                pl.BlockSpec((in_f, rank_p), lambda i: (0, 0), **weight_kwargs),
                pl.BlockSpec((rank_p, out_p), lambda i: (0, 0), **weight_kwargs),
            ],
            out_specs=pl.BlockSpec((tm, out_p), lambda i: (i, 0)),
        ),
        compiler_params=pltpu.CompilerParams(
            dimension_semantics=("parallel",),
            vmem_limit_bytes=vmem_limit_bytes,
        ),
        cost_estimate=cost_estimate,
    )


def lora_forward(x, A, B, *, alpha=32, rank=None, tm=256):
    """Computes x @ A @ B * (alpha / rank) with a Pallas TPU kernel."""
    in_features, r = A.shape
    r2, out_features = B.shape
    assert r == r2, "A / B rank mismatch"
    assert x.shape[-1] == in_features, "feature axis mismatch"
    if rank is None:
        rank = r
    scaling = alpha / rank

    lead_shape = x.shape[:-1]
    x2d = x.reshape(-1, in_features)
    M = x2d.shape[0]
    itemsize = jnp.dtype(x.dtype).itemsize

    # --- lane padding: rank and out_features up to multiples of 128 ---------
    # Exact math (padded rows/cols are zero); makes xa and the output stores
    # lane-dense. in_features is left unpadded (the block spans the full
    # feature axis) to avoid an extra HBM pass over the large x operand.
    rank_p = _round_up(r, 128)
    out_p = _round_up(out_features, 128)
    A_p = A if rank_p == r else jnp.pad(A, ((0, 0), (0, rank_p - r)))
    B_p = B
    if rank_p != r:
        B_p = jnp.pad(B_p, ((0, rank_p - r), (0, 0)))
    if out_p != out_features:
        B_p = jnp.pad(B_p, ((0, 0), (0, out_p - out_features)))

    # --- per-generation VMEM budget and tile size ----------------------------
    vmem_cap = _vmem_capacity_bytes()              # 64 MiB (v7x) / 128 MiB (v5e/v6e)
    vmem_limit = min(int(vmem_cap * 0.85), 100 * 1024 * 1024)
    weight_bytes = (A_p.size * jnp.dtype(A_p.dtype).itemsize
                    + B_p.size * jnp.dtype(B_p.dtype).itemsize)
    # Leave room for (worst-case double-buffered) weights + compiler scratch.
    tile_budget = max(vmem_limit - 2 * weight_bytes - (8 << 20), 1)
    tm_eff = _choose_tm(tm, M, in_features, out_p, rank_p, itemsize, tile_budget)

    M_pad = _round_up(M, tm_eff)
    if M_pad != M:
        x2d = jnp.pad(x2d, ((0, M_pad - M), (0, 0)))

    cost = pl.CostEstimate(
        flops=2 * M * (in_features * r + r * out_features),
        transcendentals=0,
        bytes_accessed=(M * in_features * itemsize
                        + M * out_features * itemsize
                        + weight_bytes),
    )

    call_kwargs = dict(
        M_pad=M_pad, in_f=in_features, rank_p=rank_p, out_p=out_p, tm=tm_eff,
        dtype=x.dtype, scaling=scaling, vmem_limit_bytes=vmem_limit,
        cost_estimate=cost,
    )
    try:
        out = _build_lora_call(single_buffer_weights=True, **call_kwargs)(
            x2d, A_p, B_p)
    except Exception:
        # Installed JAX rejects per-operand pipeline_mode: identical kernel
        # with the default (double-buffered) weight specs.
        out = _build_lora_call(single_buffer_weights=False, **call_kwargs)(
            x2d, A_p, B_p)

    out = out[:M, :out_features]
    return out.reshape(*lead_shape, out_features)


if __name__ == "__main__":
    # Module config (mirrors LoRA(in_features, out_features, rank=16, alpha=32)).
    in_features = 32
    out_features = 32
    rank = 16
    alpha = 32

    key = jax.random.PRNGKey(0)
    kx, ka, kb = jax.random.split(key, 3)

    # Deterministic parameter init, matching torch.randn(...) * 0.01 statistics.
    A = jax.random.normal(ka, (in_features, rank), dtype=jnp.float32) * 0.01
    B = jax.random.normal(kb, (rank, out_features), dtype=jnp.float32) * 0.01

    # Small input: batch=2, seq=8, hidden=in_features=32.
    x = jax.random.normal(kx, (2, 8, in_features), dtype=jnp.float32)

    y = lora_forward(x, A, B, alpha=alpha, rank=rank)
    y = jax.block_until_ready(y)

    # Pure-JAX reference check of the hot path.
    y_ref = (x @ A @ B) * (alpha / rank)
    assert y.shape == (2, 8, out_features)
    assert jnp.allclose(y, y_ref, atol=1e-5, rtol=1e-5)

    print("KERNEL_OK")
</pallas_src>

<mosaic_0001>
module attributes {stable_mosaic.version = 11 : i64} {
  func.func @_lora_kernel(%arg0: i32, %arg1: memref<16x32xf32, #tpu.memory_space<vmem>>, %arg2: memref<32x128xf32, #tpu.memory_space<vmem>>, %arg3: memref<128x128xf32, #tpu.memory_space<vmem>>, %arg4: memref<16x128xf32, #tpu.memory_space<vmem>>) attributes {dimension_semantics = [#tpu.dimension_semantics<parallel>], iteration_bounds = array<i64: 1>, scalar_prefetch = 0 : i64, scratch_operands = 0 : i64, tpu.core_type = #tpu.core_type<tc>, window_params = [{transform_indices = @transform_0, window_bounds = array<i64: 16, 32>}, {pipeline_mode = #tpu.pipeline_mode<synchronous>, transform_indices = @transform_1, window_bounds = array<i64: 32, 128>}, {pipeline_mode = #tpu.pipeline_mode<synchronous>, transform_indices = @transform_2, window_bounds = array<i64: 128, 128>}, {transform_indices = @transform_3, window_bounds = array<i64: 16, 128>}]} {
    %c0 = arith.constant 0 : index
    %c0_0 = arith.constant 0 : index
    %0 = vector.load %arg1[%c0, %c0_0] : memref<16x32xf32, #tpu.memory_space<vmem>>, vector<16x32xf32>
    %c0_1 = arith.constant 0 : index
    %c0_2 = arith.constant 0 : index
    %1 = vector.load %arg2[%c0_1, %c0_2] : memref<32x128xf32, #tpu.memory_space<vmem>>, vector<32x128xf32>
    %cst = arith.constant dense<0.000000e+00> : vector<16x128xf32>
    %2 = tpu.matmul %0, %1, %cst {dimension_numbers = #tpu.dot_dimension_numbers<[1], [0], [0], [1], [0, 0, 1, 1], [], []>} : vector<16x32xf32>, vector<32x128xf32>, vector<16x128xf32> -> vector<16x128xf32>
    %c0_3 = arith.constant 0 : index
    %c0_4 = arith.constant 0 : index
    %3 = vector.load %arg3[%c0_3, %c0_4] : memref<128x128xf32, #tpu.memory_space<vmem>>, vector<128x128xf32>
    %cst_5 = arith.constant dense<0.000000e+00> : vector<16x128xf32>
    %4 = tpu.matmul %2, %3, %cst_5 {dimension_numbers = #tpu.dot_dimension_numbers<[1], [0], [0], [1], [0, 0, 1, 1], [], []>} : vector<16x128xf32>, vector<128x128xf32>, vector<16x128xf32> -> vector<16x128xf32>
    %cst_6 = arith.constant 2.000000e+00 : f32
    %5 = vector.broadcast %cst_6 : f32 to vector<16x128xf32>
    %6 = arith.mulf %4, %5 : vector<16x128xf32>
    %c0_7 = arith.constant 0 : index
    %c0_8 = arith.constant 0 : index
    %7 = vector.load %arg4[%c0_7, %c0_8] : memref<16x128xf32, #tpu.memory_space<vmem>>, vector<16x128xf32>
    tpu.vector_store %arg4[%c0_7, %c0_8], %6 {strides = array<i32>} : memref<16x128xf32, #tpu.memory_space<vmem>>, vector<16x128xf32>,
    return
  }
  func.func @transform_0(%arg0: i32) -> (i32, i32) {
    %c0_i32 = arith.constant 0 : i32
    %c0_i32_0 = arith.constant 0 : i32
    return %arg0, %c0_i32 : i32, i32
  }
  func.func @transform_1(%arg0: i32) -> (i32, i32) {
    %c0_i32 = arith.constant 0 : i32
    %c0_i32_0 = arith.constant 0 : i32
    %c0_i32_1 = arith.constant 0 : i32
    return %c0_i32, %c0_i32_0 : i32, i32
  }
  func.func @transform_2(%arg0: i32) -> (i32, i32) {
    %c0_i32 = arith.constant 0 : i32
    %c0_i32_0 = arith.constant 0 : i32
    %c0_i32_1 = arith.constant 0 : i32
    return %c0_i32, %c0_i32_0 : i32, i32
  }
  func.func @transform_3(%arg0: i32) -> (i32, i32) {
    %c0_i32 = arith.constant 0 : i32
    %c0_i32_0 = arith.constant 0 : i32
    return %arg0, %c0_i32 : i32, i32
  }
}

module attributes {stable_mosaic.version = 11 : i64} {
  func.func @_lora_kernel(%arg0: i32, %arg1: memref<16x32xf32, #tpu.memory_space<vmem>>, %arg2: memref<32x128xf32, #tpu.memory_space<vmem>>, %arg3: memref<128x128xf32, #tpu.memory_space<vmem>>, %arg4: memref<16x128xf32, #tpu.memory_space<vmem>>) attributes {dimension_semantics = [#tpu.dimension_semantics<parallel>], iteration_bounds = array<i64: 1>, scalar_prefetch = 0 : i64, scratch_operands = 0 : i64, tpu.core_type = #tpu.core_type<tc>, window_params = [{transform_indices = @transform_0, window_bounds = array<i64: 16, 32>}, {pipeline_mode = #tpu.pipeline_mode<synchronous>, transform_indices = @transform_1, window_bounds = array<i64: 32, 128>}, {pipeline_mode = #tpu.pipeline_mode<synchronous>, transform_indices = @transform_2, window_bounds = array<i64: 128, 128>}, {transform_indices = @transform_3, window_bounds = array<i64: 16, 128>}]} {
    %c0 = arith.constant 0 : index
    %c0_0 = arith.constant 0 : index
    %0 = vector.load %arg1[%c0, %c0_0] : memref<16x32xf32, #tpu.memory_space<vmem>>, vector<16x32xf32>
    %c0_1 = arith.constant 0 : index
    %c0_2 = arith.constant 0 : index
    %1 = vector.load %arg2[%c0_1, %c0_2] : memref<32x128xf32, #tpu.memory_space<vmem>>, vector<32x128xf32>
    %cst = arith.constant dense<0.000000e+00> : vector<16x128xf32>
    %2 = tpu.matmul %0, %1, %cst {dimension_numbers = #tpu.dot_dimension_numbers<[1], [0], [0], [1], [0, 0, 1, 1], [], []>} : vector<16x32xf32>, vector<32x128xf32>, vector<16x128xf32> -> vector<16x128xf32>
    %c0_3 = arith.constant 0 : index
    %c0_4 = arith.constant 0 : index
    %3 = vector.load %arg3[%c0_3, %c0_4] : memref<128x128xf32, #tpu.memory_space<vmem>>, vector<128x128xf32>
    %cst_5 = arith.constant dense<0.000000e+00> : vector<16x128xf32>
    %4 = tpu.matmul %2, %3, %cst_5 {dimension_numbers = #tpu.dot_dimension_numbers<[1], [0], [0], [1], [0, 0, 1, 1], [], []>} : vector<16x128xf32>, vector<128x128xf32>, vector<16x128xf32> -> vector<16x128xf32>
    %cst_6 = arith.constant 2.000000e+00 : f32
    %5 = vector.broadcast %cst_6 : f32 to vector<16x128xf32>
    %6 = arith.mulf %4, %5 : vector<16x128xf32>
    %c0_7 = arith.constant 0 : index
    %c0_8 = arith.constant 0 : index
    %7 = vector.load %arg4[%c0_7, %c0_8] : memref<16x128xf32, #tpu.memory_space<vmem>>, vector<16x128xf32>
    tpu.vector_store %arg4[%c0_7, %c0_8], %6 {strides = array<i32>} : memref<16x128xf32, #tpu.memory_space<vmem>>, vector<16x128xf32>,
    return
  }
  func.func @transform_0(%arg0: i32) -> (i32, i32) {
    %c0_i32 = arith.constant 0 : i32
    %c0_i32_0 = arith.constant 0 : i32
    return %arg0, %c0_i32 : i32, i32
  }
  func.func @transform_1(%arg0: i32) -> (i32, i32) {
    %c0_i32 = arith.constant 0 : i32
    %c0_i32_0 = arith.constant 0 : i32
    %c0_i32_1 = arith.constant 0 : i32
    return %c0_i32, %c0_i32_0 : i32, i32
  }
  func.func @transform_2(%arg0: i32) -> (i32, i32) {
    %c0_i32 = arith.constant 0 : i32
    %c0_i32_0 = arith.constant 0 : i32
    %c0_i32_1 = arith.constant 0 : i32
    return %c0_i32, %c0_i32_0 : i32, i32
  }
  func.func @transform_3(%arg0: i32) -> (i32, i32) {
    %c0_i32 = arith.constant 0 : i32
    %c0_i32_0 = arith.constant 0 : i32
    return %arg0, %c0_i32 : i32, i32
  }
}

</mosaic_0001>

<bundles_post_ra>
// kernel: tpu_custom_call.1
= control target key start
LH: loop header
LB: loop body
LE: loop exit
PB: predicated region body
PF: predicated region fallthrough
CT: control target
= control target key end

     0   :  { %8 = vsyncpa [#allocation3], 0  ;;  %s339_s0 = inlined_call_operand.hbm [shape: f32[16,32], index: 0, kind: input, shape index: {}]   ;;  %s340_s1 = inlined_call_operand.hbm [shape: f32[32,128], index: 1, kind: input, shape index: {}]   ;;  %s341_s2 = inlined_call_operand.hbm [shape: f32[128,128], index: 2, kind: input, shape index: {}]   ;;  %s342_s3 = inlined_call_operand.hbm [shape: f32[16,128], index: 3, kind: output, shape index: {}]  }
   0x1   :  { %9 = vsyncpa [#allocation6], 0 }
   0x2   :  { %10 = vsyncpa [#allocation4], 0  ;;  %s28_s14 = sshll.u32 %s340_s1, 4  ;;  %s287_s15 = smov [#allocation5]   ;;  %s29_s14 = int_to_ptr.hbm [resolvable:$true] %s28_s14 }
   0x3   :  { %s30_s16 = sshll.u32 %s287_s15, 4  ;;  %s15_s19 = sshll.u32 %s339_s0, 4  ;;  %s31_s16 = int_to_ptr.vmem [resolvable:$true] %s30_s16  ;;  %s16_s19 = int_to_ptr.hbm [resolvable:$true] %s15_s19 }
   0x4   :  { %s288_s20 = smov 128   ;;  %s289_s21 = smov 8  }
   0x5   :  { %36 = dma.hbm_to_vmem [thread:$0]  %s29_s14, 512, %s31_s16, [#allocation6], %s288_s20, %s288_s20, %s289_s21  }
   0x6   :  { %s290_s22 = smov [#allocation2]   ;;  %s41_s1 = sshll.u32 %s341_s2, 4  ;;  %s42_s1 = int_to_ptr.hbm [resolvable:$true] %s41_s1 }
   0x7   :  { %s17_s23 = sshll.u32 %s290_s22, 4  ;;  %s291_s0 = smov [#allocation7]   ;;  %s18_s23 = int_to_ptr.vmem [resolvable:$true] %s17_s23 }
   0x8   :  { %23 = dma.hbm_to_vmem [thread:$0]  %s16_s19, 256, %s18_s23, [#allocation3], %s288_s20, %s288_s20, %s289_s21  }
   0x9   :  { %s43_s26 = sshll.u32 %s291_s0, 4  ;;  %s44_s26 = int_to_ptr.vmem [resolvable:$true] %s43_s26 }
   0xa   :  { %49 = dma.hbm_to_vmem [thread:$0]  %s42_s1, 2048, %s44_s26, [#allocation6], %s288_s20, %s288_s20, %s289_s21  }
   0xb   :  { %281 = dma.done.wait [#allocation3], 256  }
   0xc   :  { %282 = vsyncadd [#allocation3], 4294967040 }
   0xd   :  { %283 = dma.done.wait [#allocation6], 2560  }
   0xe   :  { %284 = vsyncadd [#allocation6], 4294964736  ;;  %v67_v0 = vld [vmem:[#allocation5 + $0x18] sm:$0xff]  ;;  %v66_v1 = vld [vmem:[#allocation5 + $0x10] sm:$0xff]  ;;  %vm68_vm0 = vcmask 261120   ;;  %s292_s2 = smov [#allocation8]  }
   0xf   :  { %87 = vmatpush.msra.mxu0 %v67_v0  ;;  %v65_v2 = vld [vmem:[#allocation5 + $0x8] sm:$0xff]  ;;  %v113_v3 = vld [vmem:[#allocation7 + $0x78] sm:$0xff]  ;;  %v112_v4 = vld [vmem:[#allocation7 + $0x70] sm:$0xff]  ;;  %s145_s27 = sshll.u32 %s292_s2, 4  ;;  %s147_s30 = sshll.u32 %s342_s3, 4  ;;  %s146_s27 = int_to_ptr.vmem [resolvable:$true] %s145_s27  ;;  %s148_s30 = int_to_ptr.hbm [resolvable:$true] %s147_s30 }
  0x10   :  { %114 = vmatpush.msra.mxu1 %v113_v3  ;;  %v64_v5 = vld [vmem:[#allocation5] sm:$0xff]  ;;  %v111_v6 = vld [vmem:[#allocation7 + $0x68] sm:$0xff]  ;;  %163 = vmatpush.msra.mxu2 %v113_v3  ;;  %v62_v7 = vld [vmem:[#allocation2] sm:$0xff] }
  0x11   :  { %88 = vmatpush.msra.mxu0 %v66_v1  ;;  %v110_v8 = vld [vmem:[#allocation7 + $0x60] sm:$0xff]  ;;  %v109_v9 = vld [vmem:[#allocation7 + $0x58] sm:$0xff]  ;;  %v108_v10 = vld [vmem:[#allocation7 + $0x50] sm:$0xff] }
  0x12   :  { %115 = vmatpush.msra.mxu1 %v112_v4  ;;  %164 = vmatpush.msra.mxu2 %v112_v4  ;;  %v107_v11 = vld [vmem:[#allocation7 + $0x48] sm:$0xff]  ;;  %v63_v12 = vld [vmem:[#allocation2 + $0x8] sm:$0xff]  ;;  %v106_v13 = vld [vmem:[#allocation7 + $0x40] sm:$0xff] }
  0x13   :  { %89 = vmatpush.msra.mxu0 %v65_v2  ;;  %v105_v14 = vld [vmem:[#allocation7 + $0x38] sm:$0xff]  ;;  %v104_v15 = vld [vmem:[#allocation7 + $0x30] sm:$0xff]  ;;  %v103_v16 = vld [vmem:[#allocation7 + $0x28] sm:$0xff] }
  0x14   :  { %116 = vmatpush.msra.mxu1 %v111_v6  ;;  %165 = vmatpush.msra.mxu2 %v111_v6  ;;  %v102_v17 = vld [vmem:[#allocation7 + $0x20] sm:$0xff]  ;;  %v101_v18 = vld [vmem:[#allocation7 + $0x18] sm:$0xff]  ;;  %v100_v19 = vld [vmem:[#allocation7 + $0x10] sm:$0xff] }
  0x15   :  { %90 = vmatpush.msra.mxu0 %v64_v5  ;;  %v99_v20 = vld [vmem:[#allocation7 + $0x8] sm:$0xff]  ;;  %v98_v21 = vld [vmem:[#allocation7] sm:$0xff] }
  0x16   :  { %161 = vmatmul.msk.f32.vlgmr.msra.gmra.mxu0 %vm68_vm0, %v62_v7  ;;  %117 = vmatpush.msra.mxu1 %v110_v8 }
  0x17   :  { %166 = vmatpush.msra.mxu2 %v110_v8 }
  0x18   :  { %118 = vmatpush.msra.mxu1 %v109_v9 }
  0x19   :  { %167 = vmatpush.msra.mxu2 %v109_v9 }
  0x1a   :  { %119 = vmatpush.msra.mxu1 %v108_v10 }
  0x1b   :  { %168 = vmatpush.msra.mxu2 %v108_v10 }
  0x1c   :  { %120 = vmatpush.msra.mxu1 %v107_v11 }
  0x1d   :  { %169 = vmatpush.msra.mxu2 %v107_v11 }
  0x1e   :  { %162 = vmatmul.msk.f32.gmra.mxu0 %vm68_vm0, %v63_v12  ;;  %121 = vmatpush.msra.mxu1 %v106_v13 }
  0x1f   :  { %170 = vmatpush.msra.mxu2 %v106_v13 }
  0x20   :  { %122 = vmatpush.msra.mxu1 %v105_v14 }
  0x21   :  { %171 = vmatpush.msra.mxu2 %v105_v14 }
  0x22   :  { %123 = vmatpush.msra.mxu1 %v104_v15 }
  0x23   :  { %172 = vmatpush.msra.mxu2 %v104_v15 }
  0x24   :  { %124 = vmatpush.msra.mxu1 %v103_v16 }
  0x25   :  { %173 = vmatpush.msra.mxu2 %v103_v16 }
  0x26   :  { %125 = vmatpush.msra.mxu1 %v102_v17 }
  0x27   :  { %174 = vmatpush.msra.mxu2 %v102_v17 }
  0x28   :  { %126 = vmatpush.msra.mxu1 %v101_v18 }
  0x29   :  { %175 = vmatpush.msra.mxu2 %v101_v18 }
  0x2a   :  { %127 = vmatpush.msra.mxu1 %v100_v19 }
  0x2b   :  { %176 = vmatpush.msra.mxu2 %v100_v19 }
  0x2c   :  { %128 = vmatpush.msra.mxu1 %v99_v20 }
  0x2d   :  { %177 = vmatpush.msra.mxu2 %v99_v20 }
  0x2e   :  { %129 = vmatpush.msra.mxu1 %v98_v21 }
  0x2f   :  { %178 = vmatpush.msra.mxu2 %v98_v21 }
  0x93   :  { %v92_v22 = vpop.f32.mrf.mxu0 }
  0x94   :  { %130 = vmatmul.f32.vlgmr.msra.gmra.mxu1 %v92_v22 }
  0x9b   :  { %v95_v23 = vpop.f32.mrf.mxu0 }
  0x9c   :  { %133 = vmatmul.f32.vlgmr.msra.gmra.mxu2 %v95_v23 }
 0x111   :  { %v131_v24 = vpop.f32.mrf.mxu1 }
 0x112   :  { %v137_v25 = vmul.f32 2.0, %v131_v24 }
 0x114   :  { %139 = vst [vmem:[#allocation8] sm:$0xff] %v137_v25 }
 0x11f   :  { %v134_v26 = vpop.f32.mrf.mxu2 }
 0x120   :  { %v138_v27 = vmul.f32 2.0, %v134_v26 }
 0x122   :  { %140 = vst [vmem:[#allocation8 + $0x8] sm:$0xff] %v138_v27 }
 0x123   :  { %153 = dma.vmem_to_hbm [thread:$0]  %s146_s27, 256, %s148_s30, [#allocation4], %s288_s20, %s288_s20, %s289_s21  }
 0x124   :  { %285 = dma.done.wait [#allocation4], 256  }
 0x125   :  { %286 = vsyncadd [#allocation4], 4294967040 }
 0x126   :  { %158 = vsyncpa [#allocation3], 1 }
 0x127   :  { %159 = vsyncpa [#allocation6], 1 }
 0x128   :  { %160 = vsyncpa [#allocation4], 1 }

// kernel: tpu_custom_call.1
= control target key start
LH: loop header
LB: loop body
LE: loop exit
PB: predicated region body
PF: predicated region fallthrough
CT: control target
= control target key end

     0   :  { %8 = vsyncpa [#allocation3], 0  ;;  %s339_s0 = inlined_call_operand.hbm [shape: f32[16,32], index: 0, kind: input, shape index: {}]   ;;  %s340_s1 = inlined_call_operand.hbm [shape: f32[32,128], index: 1, kind: input, shape index: {}]   ;;  %s341_s2 = inlined_call_operand.hbm [shape: f32[128,128], index: 2, kind: input, shape index: {}]   ;;  %s342_s3 = inlined_call_operand.hbm [shape: f32[16,128], index: 3, kind: output, shape index: {}]  }
   0x1   :  { %9 = vsyncpa [#allocation6], 0 }
   0x2   :  { %10 = vsyncpa [#allocation4], 0  ;;  %s28_s14 = sshll.u32 %s340_s1, 4  ;;  %s287_s15 = smov [#allocation5]   ;;  %s29_s14 = int_to_ptr.hbm [resolvable:$true] %s28_s14 }
   0x3   :  { %s30_s16 = sshll.u32 %s287_s15, 4  ;;  %s15_s19 = sshll.u32 %s339_s0, 4  ;;  %s31_s16 = int_to_ptr.vmem [resolvable:$true] %s30_s16  ;;  %s16_s19 = int_to_ptr.hbm [resolvable:$true] %s15_s19 }
   0x4   :  { %s288_s20 = smov 128   ;;  %s289_s21 = smov 8  }
   0x5   :  { %36 = dma.hbm_to_vmem [thread:$0]  %s29_s14, 512, %s31_s16, [#allocation6], %s288_s20, %s288_s20, %s289_s21  }
   0x6   :  { %s290_s22 = smov [#allocation2]   ;;  %s41_s1 = sshll.u32 %s341_s2, 4  ;;  %s42_s1 = int_to_ptr.hbm [resolvable:$true] %s41_s1 }
   0x7   :  { %s17_s23 = sshll.u32 %s290_s22, 4  ;;  %s291_s0 = smov [#allocation7]   ;;  %s18_s23 = int_to_ptr.vmem [resolvable:$true] %s17_s23 }
   0x8   :  { %23 = dma.hbm_to_vmem [thread:$0]  %s16_s19, 256, %s18_s23, [#allocation3], %s288_s20, %s288_s20, %s289_s21  }
   0x9   :  { %s43_s26 = sshll.u32 %s291_s0, 4  ;;  %s44_s26 = int_to_ptr.vmem [resolvable:$true] %s43_s26 }
   0xa   :  { %49 = dma.hbm_to_vmem [thread:$0]  %s42_s1, 2048, %s44_s26, [#allocation6], %s288_s20, %s288_s20, %s289_s21  }
   0xb   :  { %281 = dma.done.wait [#allocation3], 256  }
   0xc   :  { %282 = vsyncadd [#allocation3], 4294967040 }
   0xd   :  { %283 = dma.done.wait [#allocation6], 2560  }
   0xe   :  { %284 = vsyncadd [#allocation6], 4294964736  ;;  %v67_v0 = vld [vmem:[#allocation5 + $0x18] sm:$0xff]  ;;  %v66_v1 = vld [vmem:[#allocation5 + $0x10] sm:$0xff]  ;;  %vm68_vm0 = vcmask 261120   ;;  %s292_s2 = smov [#allocation8]  }
   0xf   :  { %87 = vmatpush.msra.mxu0 %v67_v0  ;;  %v65_v2 = vld [vmem:[#allocation5 + $0x8] sm:$0xff]  ;;  %v113_v3 = vld [vmem:[#allocation7 + $0x78] sm:$0xff]  ;;  %v112_v4 = vld [vmem:[#allocation7 + $0x70] sm:$0xff]  ;;  %s145_s27 = sshll.u32 %s292_s2, 4  ;;  %s147_s30 = sshll.u32 %s342_s3, 4  ;;  %s146_s27 = int_to_ptr.vmem [resolvable:$true] %s145_s27  ;;  %s148_s30 = int_to_ptr.hbm [resolvable:$true] %s147_s30 }
  0x10   :  { %114 = vmatpush.msra.mxu1 %v113_v3  ;;  %v64_v5 = vld [vmem:[#allocation5] sm:$0xff]  ;;  %v111_v6 = vld [vmem:[#allocation7 + $0x68] sm:$0xff]  ;;  %163 = vmatpush.msra.mxu2 %v113_v3  ;;  %v62_v7 = vld [vmem:[#allocation2] sm:$0xff] }
  0x11   :  { %88 = vmatpush.msra.mxu0 %v66_v1  ;;  %v110_v8 = vld [vmem:[#allocation7 + $0x60] sm:$0xff]  ;;  %v109_v9 = vld [vmem:[#allocation7 + $0x58] sm:$0xff]  ;;  %v108_v10 = vld [vmem:[#allocation7 + $0x50] sm:$0xff] }
  0x12   :  { %115 = vmatpush.msra.mxu1 %v112_v4  ;;  %164 = vmatpush.msra.mxu2 %v112_v4  ;;  %v107_v11 = vld [vmem:[#allocation7 + $0x48] sm:$0xff]  ;;  %v63_v12 = vld [vmem:[#allocation2 + $0x8] sm:$0xff]  ;;  %v106_v13 = vld [vmem:[#allocation7 + $0x40] sm:$0xff] }
  0x13   :  { %89 = vmatpush.msra.mxu0 %v65_v2  ;;  %v105_v14 = vld [vmem:[#allocation7 + $0x38] sm:$0xff]  ;;  %v104_v15 = vld [vmem:[#allocation7 + $0x30] sm:$0xff]  ;;  %v103_v16 = vld [vmem:[#allocation7 + $0x28] sm:$0xff] }
  0x14   :  { %116 = vmatpush.msra.mxu1 %v111_v6  ;;  %165 = vmatpush.msra.mxu2 %v111_v6  ;;  %v102_v17 = vld [vmem:[#allocation7 + $0x20] sm:$0xff]  ;;  %v101_v18 = vld [vmem:[#allocation7 + $0x18] sm:$0xff]  ;;  %v100_v19 = vld [vmem:[#allocation7 + $0x10] sm:$0xff] }
  0x15   :  { %90 = vmatpush.msra.mxu0 %v64_v5  ;;  %v99_v20 = vld [vmem:[#allocation7 + $0x8] sm:$0xff]  ;;  %v98_v21 = vld [vmem:[#allocation7] sm:$0xff] }
  0x16   :  { %161 = vmatmul.msk.f32.vlgmr.msra.gmra.mxu0 %vm68_vm0, %v62_v7  ;;  %117 = vmatpush.msra.mxu1 %v110_v8 }
  0x17   :  { %166 = vmatpush.msra.mxu2 %v110_v8 }
  0x18   :  { %118 = vmatpush.msra.mxu1 %v109_v9 }
  0x19   :  { %167 = vmatpush.msra.mxu2 %v109_v9 }
  0x1a   :  { %119 = vmatpush.msra.mxu1 %v108_v10 }
  0x1b   :  { %168 = vmatpush.msra.mxu2 %v108_v10 }
  0x1c   :  { %120 = vmatpush.msra.mxu1 %v107_v11 }
  0x1d   :  { %169 = vmatpush.msra.mxu2 %v107_v11 }
  0x1e   :  { %162 = vmatmul.msk.f32.gmra.mxu0 %vm68_vm0, %v63_v12  ;;  %121 = vmatpush.msra.mxu1 %v106_v13 }
  0x1f   :  { %170 = vmatpush.msra.mxu2 %v106_v13 }
  0x20   :  { %122 = vmatpush.msra.mxu1 %v105_v14 }
  0x21   :  { %171 = vmatpush.msra.mxu2 %v105_v14 }
  0x22   :  { %123 = vmatpush.msra.mxu1 %v104_v15 }
  0x23   :  { %172 = vmatpush.msra.mxu2 %v104_v15 }
  0x24   :  { %124 = vmatpush.msra.mxu1 %v103_v16 }
  0x25   :  { %173 = vmatpush.msra.mxu2 %v103_v16 }
  0x26   :  { %125 = vmatpush.msra.mxu1 %v102_v17 }
  0x27   :  { %174 = vmatpush.msra.mxu2 %v102_v17 }
  0x28   :  { %126 = vmatpush.msra.mxu1 %v101_v18 }
  0x29   :  { %175 = vmatpush.msra.mxu2 %v101_v18 }
  0x2a   :  { %127 = vmatpush.msra.mxu1 %v100_v19 }
  0x2b   :  { %176 = vmatpush.msra.mxu2 %v100_v19 }
  0x2c   :  { %128 = vmatpush.msra.mxu1 %v99_v20 }
  0x2d   :  { %177 = vmatpush.msra.mxu2 %v99_v20 }
  0x2e   :  { %129 = vmatpush.msra.mxu1 %v98_v21 }
  0x2f   :  { %178 = vmatpush.msra.mxu2 %v98_v21 }
  0x93   :  { %v92_v22 = vpop.f32.mrf.mxu0 }
  0x94   :  { %130 = vmatmul.f32.vlgmr.msra.gmra.mxu1 %v92_v22 }
  0x9b   :  { %v95_v23 = vpop.f32.mrf.mxu0 }
  0x9c   :  { %133 = vmatmul.f32.vlgmr.msra.gmra.mxu2 %v95_v23 }
 0x111   :  { %v131_v24 = vpop.f32.mrf.mxu1 }
 0x112   :  { %v137_v25 = vmul.f32 2.0, %v131_v24 }
 0x114   :  { %139 = vst [vmem:[#allocation8] sm:$0xff] %v137_v25 }
 0x11f   :  { %v134_v26 = vpop.f32.mrf.mxu2 }
 0x120   :  { %v138_v27 = vmul.f32 2.0, %v134_v26 }
 0x122   :  { %140 = vst [vmem:[#allocation8 + $0x8] sm:$0xff] %v138_v27 }
 0x123   :  { %153 = dma.vmem_to_hbm [thread:$0]  %s146_s27, 256, %s148_s30, [#allocation4], %s288_s20, %s288_s20, %s289_s21  }
 0x124   :  { %285 = dma.done.wait [#allocation4], 256  }
 0x125   :  { %286 = vsyncadd [#allocation4], 4294967040 }
 0x126   :  { %158 = vsyncpa [#allocation3], 1 }
 0x127   :  { %159 = vsyncpa [#allocation6], 1 }
 0x128   :  { %160 = vsyncpa [#allocation4], 1 }

</bundles_post_ra>
